<compile_context>
chip_gen: v7x
topology: tpu7x:2x2x1
jax: 0.10.0
libtpu: 0.0.40
codegen_flags: <defaults>
</compile_context>

<pallas_src>
import functools

import jax
import jax.numpy as jnp
from jax import lax
from jax.experimental import pallas as pl
from jax.experimental.pallas import tpu as pltpu

# Initial module state (from Standardizer.__init__)
_INIT_SUM = 0.0
_INIT_SUMSQ = 0.01
_INIT_COUNT = 0.01
_STD_FLOOR = 0.01

_LANE = 128
_SUBLANE = 8


# --------------------------------------------------------------------------
# VMEM budgeting (generation-aware)
# --------------------------------------------------------------------------
def _vmem_budget():
    """Returns (data_budget_bytes, vmem_limit_bytes) for the current chip."""
    cap = 64 * 1024 * 1024  # conservative fallback = v7x physical VMEM
    try:
        info = pltpu.get_tpu_info()
        cap = int(getattr(info, "vmem_capacity_bytes", cap)) or cap
    except Exception:
        pass
    limit = (cap * 3) // 4       # scoped VMEM we ask Mosaic for
    budget = (limit * 2) // 3    # bytes we allow for pipelined data slabs
    return budget, limit


def _round_down(x, m):
    return (x // m) * m


def _lane_tile(f, cap_lanes):
    """Lane tile: multiple of 128 (or full extent if F < 128), <= cap."""
    if f <= _LANE:
        return f
    return min(_round_down(f, _LANE), max(_LANE, _round_down(cap_lanes, _LANE)))


def _choose_single_pass_tf(b, f, dtype_bytes, budget):
    """Feature tile for the fused path, or None if full-B slabs don't fit."""
    # ~4 live (B, tf) slabs: double-buffered input + double-buffered output.
    cap_lanes = budget // (4 * b * dtype_bytes)
    if cap_lanes < min(f, _LANE):
        return None  # full-batch slab too tall for VMEM -> two-pass path
    tf = _lane_tile(f, cap_lanes)
    # v7x megacore: make sure the "parallel" feature axis has >= 2 tiles.
    if f >= 2 * _LANE and pl.cdiv(f, tf) == 1:
        tf = max(_LANE, _round_down(f // 2, _LANE))
    return tf


def _choose_two_pass_tiles(b, f, dtype_bytes, budget):
    """(batch_tile, feature_tile) for the tall-B two-pass path."""
    # Wide rows first (long contiguous DMA bursts) ...
    cap_lanes = max(_LANE, budget // (4 * _SUBLANE * dtype_bytes))
    tf = _lane_tile(f, min(4096, cap_lanes))
    # ... then as many batch rows as the budget allows (~4 live (tb, tf) slabs
    # in the normalize pass: 2x input + 2x output buffers).
    cap_rows = max(_SUBLANE, budget // (4 * tf * dtype_bytes))
    tb = max(_SUBLANE, _round_down(min(cap_rows, b), _SUBLANE))
    return tb, tf


# --------------------------------------------------------------------------
# Kernels
# --------------------------------------------------------------------------
def _fused_kernel(x_ref, out_ref, stats_ref, *, inv_count):
    """Full-batch (B, TF) slab: stats + normalize in one pass."""
    x = x_ref[...].astype(jnp.float32)                         # [B, TF]
    s = _INIT_SUM + jnp.sum(x, axis=0, keepdims=True)          # [1, TF]
    sq = _INIT_SUMSQ + jnp.sum(x * x, axis=0, keepdims=True)   # [1, TF]
    mean = s * inv_count
    var = jnp.maximum(sq * inv_count - mean * mean, _STD_FLOOR)
    inv_std = lax.rsqrt(var)                                    # one EUP op
    # rsqrt-then-multiply keeps the [B, TF] work on the 4 VALU slots.
    out_ref[...] = ((x - mean) * inv_std).astype(out_ref.dtype)
    # std = var * rsqrt(var): reuses the EUP result (no second sqrt).
    stats_ref[...] = jnp.concatenate([mean, var * inv_std], axis=0)


def _stats_kernel(x_ref, stats_ref, s_acc, sq_acc, *, inv_count, batch, tb):
    """Two-pass, pass 1: accumulate per-feature sums over batch tiles."""
    bi = pl.program_id(1)  # batch-reduction axis (last grid axis)

    @pl.when(bi == 0)
    def _init():
        s_acc[...] = jnp.zeros_like(s_acc)
        sq_acc[...] = jnp.zeros_like(sq_acc)

    x = x_ref[...].astype(jnp.float32)                          # [TB, TF]
    # Mask rows past the true batch size (partial last batch tile).
    rows = bi * tb + lax.broadcasted_iota(jnp.int32, x.shape, 0)
    x = jnp.where(rows < batch, x, 0.0)
    s_acc[...] += jnp.sum(x, axis=0, keepdims=True)
    sq_acc[...] += jnp.sum(x * x, axis=0, keepdims=True)

    @pl.when(bi == pl.num_programs(1) - 1)
    def _finalize():
        s = _INIT_SUM + s_acc[...]
        sq = _INIT_SUMSQ + sq_acc[...]
        mean = s * inv_count
        var = jnp.maximum(sq * inv_count - mean * mean, _STD_FLOOR)
        inv_std = lax.rsqrt(var)
        # rows: mean, std (= var * rsqrt(var)), inv_std (reused by pass 2).
        stats_ref[...] = jnp.concatenate([mean, var * inv_std, inv_std], axis=0)


def _normalize_kernel(x_ref, stats_ref, out_ref):
    """Two-pass, pass 2: normalize (TB, TF) tiles with broadcast stats."""
    x = x_ref[...].astype(jnp.float32)
    mean = stats_ref[0:1, :]
    inv_std = stats_ref[2:3, :]
    out_ref[...] = ((x - mean) * inv_std).astype(out_ref.dtype)


# --------------------------------------------------------------------------
# Wrapper
# --------------------------------------------------------------------------
def standardizer_forward(x, *, vmem_budget_bytes=None, force_two_pass=False):
    """Single forward call of Standardizer from its __init__ state.

    x: [B, F]  ->  (normalized [B, F], mean [F], std [F])
    """
    assert x.ndim == 2, "Standardizer kernel expects [batch, features]"
    b, f = x.shape
    dtype_bytes = jnp.dtype(x.dtype).itemsize
    budget, limit = _vmem_budget()
    if vmem_budget_bytes is not None:
        budget = int(vmem_budget_bytes)
    inv_count = 1.0 / (_INIT_COUNT + float(b))

    tf = None if force_two_pass else _choose_single_pass_tf(
        b, f, dtype_bytes, budget)

    if tf is not None:
        # ---------------- fused single-pass path ----------------
        grid = (pl.cdiv(f, tf),)
        kernel = functools.partial(_fused_kernel, inv_count=inv_count)
        out, stats = pl.pallas_call(
            kernel,
            out_shape=(
                jax.ShapeDtypeStruct((b, f), x.dtype),
                jax.ShapeDtypeStruct((2, f), jnp.float32),  # [mean; std]
            ),
            grid_spec=pltpu.PrefetchScalarGridSpec(
                num_scalar_prefetch=0,
                grid=grid,
                in_specs=[pl.BlockSpec((b, tf), lambda j: (0, j))],
                out_specs=[
                    pl.BlockSpec((b, tf), lambda j: (0, j)),
                    pl.BlockSpec((2, tf), lambda j: (0, j)),
                ],
            ),
            compiler_params=pltpu.CompilerParams(
                dimension_semantics=("parallel",),
                vmem_limit_bytes=limit),
        )(x)
        return out, stats[0], stats[1]

    # ---------------- two-pass path (tall B) ----------------
    tb, tf = _choose_two_pass_tiles(b, f, dtype_bytes, budget)
    nf = pl.cdiv(f, tf)
    nb = pl.cdiv(b, tb)

    stats_kernel = functools.partial(
        _stats_kernel, inv_count=inv_count, batch=b, tb=tb)
    stats = pl.pallas_call(
        stats_kernel,
        out_shape=jax.ShapeDtypeStruct((3, f), jnp.float32),
        grid_spec=pltpu.PrefetchScalarGridSpec(
            num_scalar_prefetch=0,
            grid=(nf, nb),  # batch reduction is the last grid axis
            in_specs=[pl.BlockSpec((tb, tf), lambda j, i: (i, j))],
            out_specs=pl.BlockSpec((3, tf), lambda j, i: (0, j)),
            scratch_shapes=[pltpu.VMEM((1, tf), jnp.float32),
                            pltpu.VMEM((1, tf), jnp.float32)],
        ),
        compiler_params=pltpu.CompilerParams(
            dimension_semantics=("parallel", "arbitrary"),
            vmem_limit_bytes=limit),
    )(x)

    out = pl.pallas_call(
        _normalize_kernel,
        out_shape=jax.ShapeDtypeStruct((b, f), x.dtype),
        grid_spec=pltpu.PrefetchScalarGridSpec(
            num_scalar_prefetch=0,
            grid=(nf, nb),
            in_specs=[pl.BlockSpec((tb, tf), lambda j, i: (i, j)),
                      pl.BlockSpec((3, tf), lambda j, i: (0, j))],
            out_specs=pl.BlockSpec((tb, tf), lambda j, i: (i, j)),
        ),
        compiler_params=pltpu.CompilerParams(
            dimension_semantics=("parallel", "parallel"),
            vmem_limit_bytes=limit),
    )(x, stats)

    return out, stats[0], stats[1]


# --------------------------------------------------------------------------
# Reference + self-check
# --------------------------------------------------------------------------
def _reference(x):
    xf = x.astype(jnp.float32)
    b = x.shape[0]
    s = _INIT_SUM + jnp.sum(xf, axis=0)
    sq = _INIT_SUMSQ + jnp.sum(xf * xf, axis=0)
    count = _INIT_COUNT + b
    mean = s / count
    std = jnp.sqrt(jnp.maximum(sq / count - mean * mean, _STD_FLOOR))
    return (xf - mean) / std, mean, std


def _check(x, **kwargs):
    out, mean, std = standardizer_forward(x, **kwargs)
    out = jax.block_until_ready(out)
    mean = jax.block_until_ready(mean)
    std = jax.block_until_ready(std)
    ref_out, ref_mean, ref_std = _reference(x)
    assert jnp.allclose(out, ref_out, atol=1e-4, rtol=1e-5)
    assert jnp.allclose(mean, ref_mean, atol=1e-5, rtol=1e-5)
    assert jnp.allclose(std, ref_std, atol=1e-5, rtol=1e-5)


if __name__ == "__main__":
    key = jax.random.PRNGKey(0)

    # 1) Fused single-pass path; F=256 -> forced into 2 feature tiles
    #    (exercises the multi-tile / megacore-parallel path).
    x1 = jax.random.normal(key, (8, 256), dtype=jnp.float32) * 2.0 + 0.5
    _check(x1)

    # 2) Non-multiple-of-128 feature count -> partial last lane tile.
    x2 = jax.random.normal(jax.random.PRNGKey(1), (8, 200), dtype=jnp.float32)
    _check(x2)

    # 3) Force the tall-batch two-pass path on a small shape (tiny budget
    #    override gives multiple batch tiles + a masked partial batch tile).
    x3 = jax.random.normal(jax.random.PRNGKey(2), (60, 200), dtype=jnp.float32)
    _check(x3, force_two_pass=True, vmem_budget_bytes=64 * 1024)

    print("KERNEL_OK")
</pallas_src>

<mosaic_0001>
module attributes {stable_mosaic.version = 11 : i64} {
  func.func @_fused_kernel(%arg0: i32, %arg1: memref<8x128xf32, #tpu.memory_space<vmem>>, %arg2: memref<8x128xf32, #tpu.memory_space<vmem>>, %arg3: memref<2x128xf32, #tpu.memory_space<vmem>>) attributes {dimension_semantics = [#tpu.dimension_semantics<parallel>], iteration_bounds = array<i64: 2>, scalar_prefetch = 0 : i64, scratch_operands = 0 : i64, tpu.core_type = #tpu.core_type<tc>, window_params = [{transform_indices = @transform_0, window_bounds = array<i64: 8, 128>}, {transform_indices = @transform_1, window_bounds = array<i64: 8, 128>}, {transform_indices = @transform_2, window_bounds = array<i64: 2, 128>}]} {
    %c0 = arith.constant 0 : index
    %c0_0 = arith.constant 0 : index
    %0 = vector.load %arg1[%c0, %c0_0] : memref<8x128xf32, #tpu.memory_space<vmem>>, vector<8x128xf32>
    %cst = arith.constant dense<0.000000e+00> : vector<128xf32>
    %1 = vector.multi_reduction <add>, %0, %cst [0] : vector<8x128xf32> to vector<128xf32>
    %2 = vector.shape_cast %1 : vector<128xf32> to vector<1x128xf32>
    %cst_1 = arith.constant 0.000000e+00 : f32
    %3 = vector.broadcast %cst_1 : f32 to vector<1x128xf32>
    %4 = arith.addf %3, %2 : vector<1x128xf32>
    %5 = arith.mulf %0, %0 : vector<8x128xf32>
    %cst_2 = arith.constant dense<0.000000e+00> : vector<128xf32>
    %6 = vector.multi_reduction <add>, %5, %cst_2 [0] : vector<8x128xf32> to vector<128xf32>
    %7 = vector.shape_cast %6 : vector<128xf32> to vector<1x128xf32>
    %cst_3 = arith.constant 0.00999999977 : f32
    %8 = vector.broadcast %cst_3 : f32 to vector<1x128xf32>
    %9 = arith.addf %8, %7 : vector<1x128xf32>
    %cst_4 = arith.constant 0.124843948 : f32
    %10 = vector.broadcast %cst_4 : f32 to vector<1x128xf32>
    %11 = arith.mulf %4, %10 : vector<1x128xf32>
    %cst_5 = arith.constant 0.124843948 : f32
    %12 = vector.broadcast %cst_5 : f32 to vector<1x128xf32>
    %13 = arith.mulf %9, %12 : vector<1x128xf32>
    %14 = arith.mulf %11, %11 : vector<1x128xf32>
    %15 = arith.subf %13, %14 : vector<1x128xf32>
    %cst_6 = arith.constant 0.00999999977 : f32
    %16 = vector.broadcast %cst_6 : f32 to vector<1x128xf32>
    %17 = arith.maximumf %15, %16 : vector<1x128xf32>
    %18 = math.rsqrt %17 : vector<1x128xf32>
    %19 = vector.broadcast %11 : vector<1x128xf32> to vector<8x128xf32>
    %20 = arith.subf %0, %19 : vector<8x128xf32>
    %21 = vector.broadcast %18 : vector<1x128xf32> to vector<8x128xf32>
    %22 = arith.mulf %20, %21 : vector<8x128xf32>
    %c0_7 = arith.constant 0 : index
    %c0_8 = arith.constant 0 : index
    %23 = vector.load %arg2[%c0_7, %c0_8] : memref<8x128xf32, #tpu.memory_space<vmem>>, vector<8x128xf32>
    tpu.vector_store %arg2[%c0_7, %c0_8], %22 {strides = array<i32>} : memref<8x128xf32, #tpu.memory_space<vmem>>, vector<8x128xf32>,
    %24 = arith.mulf %17, %18 : vector<1x128xf32>
    %25 = tpu.concatenate %11, %24 in 0 : vector<1x128xf32>, vector<1x128xf32> -> vector<2x128xf32>
    %c0_9 = arith.constant 0 : index
    %c0_10 = arith.constant 0 : index
    %26 = vector.load %arg3[%c0_9, %c0_10] : memref<2x128xf32, #tpu.memory_space<vmem>>, vector<2x128xf32>
    tpu.vector_store %arg3[%c0_9, %c0_10], %25 {strides = array<i32>} : memref<2x128xf32, #tpu.memory_space<vmem>>, vector<2x128xf32>,
    return
  }
  func.func @transform_0(%arg0: i32) -> (i32, i32) {
    %c0_i32 = arith.constant 0 : i32
    %c0_i32_0 = arith.constant 0 : i32
    return %c0_i32, %arg0 : i32, i32
  }
  func.func @transform_1(%arg0: i32) -> (i32, i32) {
    %c0_i32 = arith.constant 0 : i32
    %c0_i32_0 = arith.constant 0 : i32
    return %c0_i32, %arg0 : i32, i32
  }
  func.func @transform_2(%arg0: i32) -> (i32, i32) {
    %c0_i32 = arith.constant 0 : i32
    %c0_i32_0 = arith.constant 0 : i32
    return %c0_i32, %arg0 : i32, i32
  }
}

</mosaic_0001>

<bundles_post_ra>
// kernel: tpu_custom_call.1
= control target key start
LH: loop header
LB: loop body
LE: loop exit
PB: predicated region body
PF: predicated region fallthrough
CT: control target
= control target key end

     0   :  { %8 = vsyncpa [#allocation3], 0  ;;  %s741_s0 = inlined_call_operand.hbm [shape: f32[8,256], index: 0, kind: input, shape index: {}]   ;;  %s742_s1 = inlined_call_operand.hbm [shape: f32[8,256], index: 1, kind: output, shape index: {0}]   ;;  %s743_s2 = inlined_call_operand.hbm [shape: f32[2,256], index: 2, kind: output, shape index: {1}]  }
   0x1   :  { %10 = vsyncpa [#allocation3 + $0x1], 0 }
   0x2   :  { %11 = vsyncpa [#allocation4], 0 }
   0x3   :  { %13 = vsyncpa [#allocation4 + $0x1], 0 }
   0x4   :  { %14 = vsyncpa [#allocation7], 0 }
   0x5   :  { %16 = vsyncpa [#allocation7 + $0x1], 0  ;;  %s549_s9 = smov 0   ;;  %s551_s10 = smov 0  }
   0x6   :  { %s553_s11 = smov 0   ;;  %s555_s12 = smov 0  }
   0x7 LB: > { %s570_s13 = sadd.s32 4294967295, %s529_s12   ;;  %s333_s14 = sadd.s32 4294967294, %s529_s12   ;;  %s529_s12 = sphi %s555_s12, %s758_s12   ;;  %s525_s11 = sphi %s553_s11, %s757_s11   ;;  %s521_s10 = sphi %s551_s10, %s756_s10   ;;  %s517_s9 = sphi %s549_s9, %s755_s9  }
   0x8   : > { %s574_s15 = sadd.s32 1, %s529_s12   ;;  %s29_s16 = sadd.s32 1, %s525_s11 }
   0x9   : > { %s26_s17 = ssub.s32 %s529_s12, %s574_s15  ;;  %p36_p0 = scmp.ne.s32.totalorder %s525_s11, %s521_s10 }
   0xa   : > { %p27_p1 = scmp.eq.s32.totalorder %s26_s17, 0  ;;  %p37_p2 = scmp.eq.s32.totalorder %s529_s12, 0 }
   0xb   : > { %p42_p3 = scmp.ne.s32.totalorder %s521_s10, %s517_s9  ;;  %p43_p4 = scmp.eq.s32.totalorder %s570_s13, 0 }
   0xc   : > { %s586_s18 = scalar_select %p27_p1, %s525_s11, %s29_s16  }
   0xd   : > { %p588_p5 = por %p37_p2, %p36_p0  ;;  %p592_p6 = por %p43_p4, %p42_p3 }
   0xe   : > { %p66_p7 = scmp.eq.s32.totalorder %s570_s13, 1  ;;  %p72_p8 = scmp.eq.s32.totalorder %s333_s14, 1 }
   0xf   : > { %p365_p10 = scmp.lt.s32.totalorder %s529_s12, 2  ;;  %s118_s23 = sand.u32 1, %s525_s11  }
  0x10   : > { %p599_p11 = por %p66_p7, %p36_p0  ;;  %p603_p12 = por %p72_p8, %p42_p3 }
  0x11   : > { %s337_s24 = sshll.u32 %s529_s12, 7  ;;  %s336_s25 = sshll.u32 %s118_s23, 3 }
  0x12   : > { %s747_s21 = scalar_select %p599_p11, 1, 0 }
  0x13   : > { %s748_s22 = scalar_select %p603_p12, 1, 0 }
  0x14   : > { %s612_s28 = scalar_lea.hbm %s741_s0, %s337_s24  ;;  %s122_s29 = scalar_lea.vmem [#allocation2], %s336_s25 }
  0x15   : > { %s129_s30 = sshll.u32 %s122_s29, 4  ;;  %p616_p13 = pnand %p365_p10, %p588_p5  ;;  %s620_s30 = int_to_ptr.vmem [resolvable:$true] %s129_s30 }
  0x16   : > { %s119_s4 = scalar_lea.sflag [#allocation3], %s118_s23  ;;  %s401_s5 = scalar_lea.hbm %s612_s28, 128 }
  0x17   : > { %p402_p2 = scmp.ne.s32.totalorder %s612_s28, %s401_s5  ;;  %p403_p3 = pneg %p616_p13 }
  0x18   : > { %s406_s8 = scalar_lea.hbm %s741_s0, 256  ;;  %p407_p5 = scmp.lt.u32.totalorder %s612_s28, %s741_s0 }
  0x19   : > { %p404_p4 = pnand %p403_p3, %p402_p2  ;;  %p408_p8 = scmp.lt.u32.totalorder %s406_s8, %s401_s5 }
  0x1a   : > { %p410_p9 = scmp.lt.u32.totalorder %s401_s5, %s612_s28 }
  0x1b   : > { %p405_p7 = pneg %p404_p4  ;;  %p409_p10 = por %p408_p8, %p407_p5 }
  0x1d   : > { %p411_p0 = por %p410_p9, %p409_p10 }
  0x1f   : > { %p412_p1 = pnand %p411_p0, %p405_p7 }
  0x21   : > { %415 = shalt.err (!%p412_p1)
}
  0x22   : > { %s416_s17 = scalar_lea.vmem %s620_s30, 128  ;;  %s531_s19 = smov [#allocation2]  }
  0x23   : > { %p417_p2 = scmp.ne.s32.totalorder %s620_s30, %s416_s17  ;;  %s421_s23 = sshll.u32 %s531_s19, 4  ;;  %s422_s23 = int_to_ptr.vmem [resolvable:$false] %s421_s23 }
  0x24   : > { %s423_s24 = scalar_lea.vmem %s422_s23, 256  ;;  %p424_p11 = scmp.lt.s32.totalorder %s620_s30, %s422_s23 }
  0x25   : > { %p419_p4 = pnand %p417_p2, %p403_p3  ;;  %p425_p5 = scmp.lt.s32.totalorder %s423_s24, %s416_s17 }
  0x27   : > { %p420_p12 = pneg %p419_p4  ;;  %p426_p8 = por %p425_p5, %p424_p11 }
  0x29   : > { %p427_p9 = pnand %p426_p8, %p420_p12 }
  0x2b   : > { %430 = shalt.err (!%p427_p9)
}
  0x2c   : > { %357 = dma.hbm_to_vmem [thread:$0]  (!%p616_p13), %s612_s28, 128, %s620_s30, %s119_s4  }
  0x2d   : > { %p750_p0 = scmp.lt.s32.totalorder %s529_s12, 3  ;;  %p751_p1 = scmp.ge.s32.totalorder %s529_s12, 1 }
  0x2f   : > { %p135_p3 = pnand %p751_p1, %p750_p0 }
  0x30   : > { %s654_s25 = sand.u32 (!%p135_p3), 1, %s521_s10  }
  0x31   : > { %138 = sbr.rel (%p135_p3) target bundleno = 131 (0x83), region = 24  ;;  %s339_s26 = sshll.u32 (!%p135_p3), %s654_s25, 3 }
  0x32   : > { %s141_s27 = scalar_lea.sflag (!%p135_p3), [#allocation3], %s654_s25  ;;  %s144_s29 = scalar_lea.vmem (!%p135_p3), [#allocation2], %s339_s26 }
  0x38   : > { %504 = dma.done.wait (%p592_p6), %s141_s27, 128  }
  0x39   : > { %506 = vsyncadd (%p592_p6), %s141_s27, 4294967168  ;;  %v170_v0 = vld [vmem:[%s144_s29] sm:$0xff]  ;;  %s341_s20 = sshll.u32 %s654_s25, 1  ;;  %s162_s28 = scalar_lea.vmem [#allocation5], %s339_s26  ;;  %vm196_vm0 = vcmask 1040384  }
  0x3a   : > { %v171_v1 = vrot.slane %v170_v0, 4  ;;  %v178_v2 = vmul.f32 %v170_v0, %v170_v0  ;;  %s218_s30 = sshll.u32 %s162_s28, 4  ;;  %s169_s3 = scalar_lea.vmem [#allocation6], %s341_s20  ;;  %s665_s30 = int_to_ptr.vmem [resolvable:$true] %s218_s30 }
  0x3b   : > { %s231_s4 = sshll.u32 %s169_s3, 4  ;;  %s344_s5 = sshll.u32 %s570_s13, 7  ;;  %s667_s4 = int_to_ptr.vmem [resolvable:$true] %s231_s4 }
  0x3c   : > { %v172_v3 = vadd.f32 %v171_v1, %v170_v0  ;;  %v179_v4 = vrot.slane %v178_v2, 4  ;;  %s345_s6 = sshll.u32 %s570_s13, 5  ;;  %s672_s14 = scalar_lea.hbm %s742_s1, %s344_s5 }
  0x3d   : > { %s677_s13 = scalar_lea.hbm %s743_s2, %s345_s6  ;;  %s200_s19 = scalar_lea.sflag [#allocation4], %s654_s25 }
  0x3e   : > { %v173_v5 = vrot.slane %v172_v3, 2  ;;  %v180_v6 = vadd.f32 %v179_v4, %v178_v2  ;;  %s431_s23 = scalar_lea.vmem %s665_s30, 128  ;;  %p752_p11 = scmp.ne.s32.totalorder %s747_s21, 0 }
  0x3f   : > { %p432_p6 = scmp.ne.s32.totalorder %s665_s30, %s431_s23  ;;  %s532_s24 = smov [#allocation5]  }
  0x40   : > { %v174_v7 = vadd.f32 %v173_v5, %v172_v3  ;;  %v181_v8 = vrot.slane %v180_v6, 2  ;;  %s435_s26 = sshll.u32 %s532_s24, 4  ;;  %s436_s26 = int_to_ptr.vmem [resolvable:$false] %s435_s26 }
  0x41   : > { %p433_p12 = pnand %p432_p6, %p752_p11  ;;  %s437_s27 = scalar_lea.vmem %s436_s26, 256 }
  0x42   : > { %v175_v9 = vrot.slane %v174_v7, 1  ;;  %v182_v10 = vadd.f32 %v181_v8, %v180_v6  ;;  %p438_p7 = scmp.lt.s32.totalorder %s665_s30, %s436_s26  ;;  %p439_p10 = scmp.lt.s32.totalorder %s437_s27, %s431_s23 }
  0x43   : > { %p434_p13 = pneg %p433_p12 }
  0x44   : > { %v176_v11 = vadd.f32 %v175_v9, %v174_v7  ;;  %v183_v12 = vrot.slane %v182_v10, 1  ;;  %p440_p2 = por %p439_p10, %p438_p7 }
  0x46   : > { %v184_v13 = vadd.f32 %v183_v12, %v182_v10  ;;  %v186_v14 = vmul.f32 0.12484395, %v176_v11  ;;  %p441_p4 = pnand %p440_p2, %p434_p13 }
  0x48   : > { %v185_v15 = vadd.f32 0.01, %v184_v13  ;;  %v188_v16 = vmul.f32 %v186_v14, %v186_v14  ;;  %v192_v20 = vsub.f32 %v170_v0, %v186_v14 }
  0x4a   : > { %v187_v17 = vmul.f32 0.12484395, %v185_v15 }
  0x4c   : > { %v189_v18 = vsub.f32 %v187_v17, %v188_v16 }
  0x4e   : > { %v190_v19 = vmax.f32 %v189_v18, 0.01 }
  0x50   : > { %399 = vrsqrt.f32 %v190_v19 }
  0x5a   : > { %v400_v21 = vpop.eup %399 }
  0x5b   : > { %v193_v22 = vmul.f32 %v400_v21, %v192_v20  ;;  %v195_v23 = vmul.f32 %v400_v21, %v190_v19 }
  0x5d   : > { %194 = vst [vmem:[%s162_s28] sm:$0xff] %v193_v22  ;;  %v197_v24 = vsel %vm196_vm0, %v186_v14, %v195_v23 }
  0x5e   : > { %198 = vst [vmem:[%s169_s3] sm:$0x3] %v197_v24 }
  0x5f   : > { %444 = shalt.err (!%p441_p4)
}
  0x60   : > { %s445_s29 = scalar_lea.hbm %s672_s14, 128  ;;  %s449_s3 = scalar_lea.hbm %s742_s1, 256 }
  0x61   : > { %p446_p5 = scmp.ne.s32.totalorder %s672_s14, %s445_s29  ;;  %p450_p0 = scmp.lt.u32.totalorder %s672_s14, %s742_s1 }
  0x62   : > { %p451_p1 = scmp.lt.u32.totalorder %s449_s3, %s445_s29  ;;  %p453_p6 = scmp.lt.u32.totalorder %s445_s29, %s672_s14 }
  0x63   : > { %p447_p8 = pnand %p446_p5, %p752_p11 }
  0x64   : > { %p452_p3 = por %p451_p1, %p450_p0 }
  0x65   : > { %p448_p9 = pneg %p447_p8 }
  0x66   : > { %p454_p12 = por %p453_p6, %p452_p3 }
  0x68   : > { %p455_p13 = pnand %p454_p12, %p448_p9 }
  0x6a   : > { %458 = shalt.err (!%p455_p13)
}
  0x6b   : > { %350 = dma.vmem_to_hbm [thread:$0]  (%p752_p11), %s665_s30, 128, %s672_s14, %s200_s19  }
  0x6c   : > { %s205_s7 = scalar_lea.sflag [#allocation7], %s654_s25  ;;  %s459_s8 = scalar_lea.vmem %s667_s4, 32 }
  0x6d   : > { %p460_p7 = scmp.ne.s32.totalorder %s667_s4, %s459_s8  ;;  %s533_s16 = smov [#allocation6]  }
  0x6e   : > { %s463_s17 = sshll.u32 %s533_s16, 4  ;;  %s464_s17 = int_to_ptr.vmem [resolvable:$false] %s463_s17 }
  0x6f   : > { %p461_p10 = pnand %p460_p7, %p752_p11  ;;  %s465_s23 = scalar_lea.vmem %s464_s17, 64 }
  0x70   : > { %p466_p4 = scmp.lt.s32.totalorder %s667_s4, %s464_s17  ;;  %p467_p5 = scmp.lt.s32.totalorder %s465_s23, %s459_s8 }
  0x71   : > { %p462_p2 = pneg %p461_p10 }
  0x72   : > { %p468_p8 = por %p467_p5, %p466_p4 }
  0x74   : > { %p469_p9 = pnand %p468_p8, %p462_p2 }
  0x76   : > { %472 = shalt.err (!%p469_p9)
}
  0x77   : > { %s473_s25 = scalar_lea.hbm %s677_s13, 32  ;;  %s477_s19 = scalar_lea.hbm %s743_s2, 64 }
  0x78   : > { %p474_p0 = scmp.ne.s32.totalorder %s677_s13, %s473_s25  ;;  %p478_p6 = scmp.lt.u32.totalorder %s677_s13, %s743_s2 }
  0x79   : > { %p479_p12 = scmp.lt.u32.totalorder %s477_s19, %s473_s25  ;;  %p481_p7 = scmp.lt.u32.totalorder %s473_s25, %s677_s13 }
  0x7a   : > { %p475_p1 = pnand %p474_p0, %p752_p11 }
  0x7b   : > { %p480_p13 = por %p479_p12, %p478_p6 }
  0x7c   : > { %p476_p3 = pneg %p475_p1 }
  0x7d   : > { %p482_p10 = por %p481_p7, %p480_p13 }
  0x7f   : > { %p483_p2 = pnand %p482_p10, %p476_p3 }
  0x81   : > { %486 = shalt.err (!%p483_p2)
}
  0x82   : > { %351 = dma.vmem_to_hbm [thread:$0]  (%p752_p11), %s667_s4, 32, %s677_s13, %s205_s7  }
  0x83 PF: > { %s243_s27 = sand.u32 1, %s517_s9   ;;  %p753_p4 = scmp.ne.s32.totalorder %s748_s22, 0 }
  0x84   : > { %p754_p5 = scmp.ge.s32.totalorder %s529_s12, 2  ;;  %s244_s29 = scalar_lea.sflag [#allocation4], %s243_s27 }
  0x86   : > { %p359_p8 = pnand %p754_p5, %p753_p4 }
  0x88   : > { %508 = dma.done.wait (!%p359_p8), %s244_s29, 128  }
  0x89   : > { %510 = vsyncadd (!%p359_p8), %s244_s29, 4294967168  ;;  %s253_s20 = scalar_lea.sflag [#allocation7], %s243_s27 }
  0x8a   : > { %512 = dma.done.wait (!%p359_p8), %s253_s20, 32  }
  0x8b   : > { %514 = vsyncadd (!%p359_p8), %s253_s20, 4294967264  ;;  %p19_p11 = scmp.ge.s32.totalorder %s574_s15, 4   ;;  %s755_s9 = smov %s521_s10 }
  0x8c   : > { %s756_s10 = smov %s525_s11  ;;  %s757_s11 = smov %s586_s18 }
  0x8d   : > { %s758_s12 = smov %s574_s15  ;;  %21 = sbr.rel (!%p19_p11) target bundleno = 7 (0x7), region = 86 }
  0x94   :  { %258 = vsyncpa [#allocation3], 1 }
  0x95   :  { %260 = vsyncpa [#allocation3 + $0x1], 1 }
  0x96   :  { %261 = vsyncpa [#allocation4], 1 }
  0x97   :  { %263 = vsyncpa [#allocation4 + $0x1], 1 }
  0x98   :  { %264 = vsyncpa [#allocation7], 1 }
  0x99   :  { %266 = vsyncpa [#allocation7 + $0x1], 1 }

</bundles_post_ra>
